<compile_context>
chip_gen: v7x
topology: tpu7x:2x2x1
jax: 0.10.0
libtpu: 0.0.40
codegen_flags: <defaults>
</compile_context>

<pallas_src>
import jax
import jax.numpy as jnp
from jax.experimental import pallas as pl
from jax.experimental.pallas import tpu as pltpu


def cnn_kernel(x_ref, w_ref, b_ref, o_ref, acc_ref):
    # x_ref:   (1, TB, KCp) bf16 -- im2col window for time step t of this batch tile
    # w_ref:   (KCp, Op)    bf16 -- resident weight
    # b_ref:   (1, Op)      f32  -- resident bias
    # o_ref:   (TB, Op)     bf16 -- output tile (written back after the last time step)
    # acc_ref: (TB, Op)     f32  -- running max over time (VMEM scratch)
    t = pl.program_id(1)

    @pl.when(t == 0)
    def _():
        acc_ref[...] = jnp.full(acc_ref.shape, -jnp.inf, acc_ref.dtype)

    # One deep-contraction MXU matmul per (batch tile, time step); lhs/rhs lane-dense.
    part = jnp.dot(x_ref[0], w_ref[...], preferred_element_type=jnp.float32)  # (TB, Op)
    acc_ref[...] = jnp.maximum(acc_ref[...], part)                            # VPU max

    @pl.when(t == pl.num_programs(1) - 1)
    def _():
        # bias + clamp(min=0) AFTER the max: exact because bias is per-channel constant
        # over time and ReLU is monotone -> max_t relu(a_t + b) == relu(max_t a_t + b).
        o_ref[...] = jnp.maximum(acc_ref[...] + b_ref[...], 0.0).astype(o_ref.dtype)


def _round_up(n, m):
    return (n + m - 1) // m * m


def _choose_tile(B, *, max_tb=512):
    """Batch tile size / padded batch. Even grid (>1) balances v7x's two TensorCores;
    deriving TB from the grid count keeps padded-batch waste to <= 8 rows."""
    n = max(1, -(-B // max_tb))
    if n > 1 and (n % 2):
        n += 1
    tb = _round_up(-(-B // n), 8)
    b_pad = _round_up(B, tb)
    return tb, b_pad


def cnn_forward_channels_last(x_bmc, weight_ock, bias_o, *, max_block_b=512,
                              out_dtype=jnp.bfloat16):
    """x_bmc: (B, m_word, e_char) channels-last (what the char-embedding lookup produces).
    weight_ock: (out_ch, e_char, k) PyTorch Conv1d weight; bias_o: (out_ch,).
    Returns (B, out_ch) in out_dtype (bf16 by default for the downstream highway layer)."""
    B, M, C = x_bmc.shape
    O, C_w, K = weight_ock.shape
    assert C_w == C, (C_w, C)
    L = M - K + 1
    assert L >= 1

    KC = K * C
    KCp = _round_up(KC, 128)          # lane-dense contraction (128-deep MXU native)
    Op = _round_up(O, 128)            # lane-dense output (unmasked vst)
    TB, B_pad = _choose_tile(B, max_tb=max_block_b)

    # Wrapper-side im2col (done once by XLA): win[t, b, j*C + c] = x[b, t + j, c].
    x = x_bmc.astype(jnp.bfloat16)    # bf16 matmul operands, f32 accumulation
    win = jnp.concatenate([x[:, j:j + L, :] for j in range(K)], axis=-1)   # (B, L, KC)
    win = jnp.swapaxes(win, 0, 1)                                          # (L, B, KC)
    win = jnp.pad(win, ((0, 0), (0, B_pad - B), (0, KCp - KC)))            # zero pad

    # (O, C, K) -> (K, C, O) -> (KC, O): row index j*C + c matches the window layout.
    w2d = jnp.transpose(weight_ock, (2, 1, 0)).reshape(KC, O).astype(jnp.bfloat16)
    w2d = jnp.pad(w2d, ((0, KCp - KC), (0, Op - O)))
    b2d = jnp.pad(bias_o.reshape(1, O).astype(jnp.float32), ((0, 0), (0, Op - O)))

    out = pl.pallas_call(
        cnn_kernel,
        out_shape=jax.ShapeDtypeStruct((B_pad, Op), out_dtype),
        grid=(B_pad // TB, L),                              # time (reduction) axis last
        in_specs=[
            pl.BlockSpec((1, TB, KCp), lambda i, t: (t, i, 0)),   # window tile
            pl.BlockSpec((KCp, Op), lambda i, t: (0, 0)),         # weight resident
            pl.BlockSpec((1, Op), lambda i, t: (0, 0)),           # bias resident
        ],
        out_specs=pl.BlockSpec((TB, Op), lambda i, t: (i, 0)),    # resident across t
        scratch_shapes=[pltpu.VMEM((TB, Op), jnp.float32)],       # bounded running max
        compiler_params=pltpu.CompilerParams(
            dimension_semantics=("parallel", "arbitrary"),
            vmem_limit_bytes=48 << 20,                            # ample headroom, <64 MiB v7x
        ),
    )(win, w2d, b2d)
    return out[:B, :O]


def cnn_forward(x_ncw, weight_ock, bias_o, **kw):
    """PyTorch-layout entry: x (B, e_char, m_word) [NCW], exactly the module's forward.
    Prefer cnn_forward_channels_last to skip this extra XLA transpose."""
    return cnn_forward_channels_last(jnp.transpose(x_ncw, (0, 2, 1)),
                                     weight_ock, bias_o, **kw)


def cnn_reference_f32(x_bmc, weight_ock, bias_o):
    """Pure-JAX f32 reference mirroring the PyTorch forward (channels-last input)."""
    B, M, C = x_bmc.shape
    O, _, K = weight_ock.shape
    L = M - K + 1
    conv = jnp.zeros((B, L, O), jnp.float32)
    for j in range(K):
        conv = conv + jnp.einsum("blc,oc->blo", x_bmc[:, j:j + L, :], weight_ock[:, :, j])
    conv = conv + bias_o[None, None, :]
    conv = jnp.maximum(conv, 0.0)
    return jnp.max(conv, axis=1)


def cnn_reference_bf16(x_bmc, weight_ock, bias_o):
    """Reference with the kernel's numerics: bf16 operands, f32 accumulate, bias+ReLU."""
    xb = x_bmc.astype(jnp.bfloat16)
    wb = weight_ock.astype(jnp.bfloat16)
    B, M, C = x_bmc.shape
    O, _, K = weight_ock.shape
    L = M - K + 1
    conv = jnp.zeros((B, L, O), jnp.float32)
    for j in range(K):
        conv = conv + jnp.einsum("blc,oc->blo", xb[:, j:j + L, :], wb[:, :, j],
                                 preferred_element_type=jnp.float32)
    conv = conv + bias_o[None, None, :].astype(jnp.float32)
    conv = jnp.maximum(conv, 0.0)
    return jnp.max(conv, axis=1)


if __name__ == "__main__":
    # Small shapes consistent with the module's forward:
    #   e_char=16, k=5, m_word=16, output_channels=32, batch=8
    B, e_char, k, m_word, out_ch = 8, 16, 5, 16, 32

    key = jax.random.PRNGKey(0)
    kx, kw, kb = jax.random.split(key, 3)

    # Channels-last input (what the char-embedding lookup naturally produces) and the
    # PyTorch NCW view the module's forward actually takes.
    x_bmc = jax.random.normal(kx, (B, m_word, e_char), dtype=jnp.float32)
    x_ncw = jnp.transpose(x_bmc, (0, 2, 1))            # (B, e_char, m_word)

    # Deterministic Conv1d parameter init (PyTorch-style uniform bound).
    fan_in = e_char * k
    bound = 1.0 / jnp.sqrt(jnp.float32(fan_in))
    weight = jax.random.uniform(kw, (out_ch, e_char, k), jnp.float32, -bound, bound)
    bias = jax.random.uniform(kb, (out_ch,), jnp.float32, -bound, bound)

    # Module-layout (NCW) entry, bf16 output.
    out = jax.block_until_ready(cnn_forward(x_ncw, weight, bias))
    assert out.shape == (B, out_ch), out.shape
    out_f32 = out.astype(jnp.float32)

    # Tight check against a reference with matching (bf16 matmul, f32 accum) numerics.
    ref_bf16 = cnn_reference_bf16(x_bmc, weight, bias)
    assert jnp.allclose(out_f32, ref_bf16, atol=2e-2, rtol=2e-2), \
        "mismatch vs bf16-matched reference"

    # Looser check against the pure-f32 PyTorch-semantics reference (bf16 rounding slack).
    ref_f32 = cnn_reference_f32(x_bmc, weight, bias)
    assert jnp.allclose(out_f32, ref_f32, atol=5e-2, rtol=5e-2), "mismatch vs f32 reference"

    # Channels-last entry gives identical results to the NCW wrapper.
    out_cl = jax.block_until_ready(cnn_forward_channels_last(x_bmc, weight, bias))
    assert jnp.allclose(out_cl.astype(jnp.float32), out_f32, atol=1e-6, rtol=1e-6), \
        "channels-last / NCW entry mismatch"

    print("KERNEL_OK")
</pallas_src>

<mosaic_0001>
module attributes {stable_mosaic.version = 11 : i64} {
  func.func @cnn_kernel(%arg0: i32, %arg1: i32, %arg2: memref<1x8x128xbf16, #tpu.memory_space<vmem>>, %arg3: memref<128x128xbf16, #tpu.memory_space<vmem>>, %arg4: memref<1x128xf32, #tpu.memory_space<vmem>>, %arg5: memref<8x128xbf16, #tpu.memory_space<vmem>>, %arg6: memref<8x128xf32, #tpu.memory_space<vmem>>) attributes {dimension_semantics = [#tpu.dimension_semantics<parallel>, #tpu.dimension_semantics<arbitrary>], iteration_bounds = array<i64: 1, 12>, scalar_prefetch = 0 : i64, scratch_operands = 1 : i64, tpu.core_type = #tpu.core_type<tc>, window_params = [{transform_indices = @transform_0, window_bounds = array<i64: 1, 8, 128>}, {pipeline_mode = #tpu.pipeline_mode<synchronous>, transform_indices = @transform_1, window_bounds = array<i64: 128, 128>}, {pipeline_mode = #tpu.pipeline_mode<synchronous>, transform_indices = @transform_2, window_bounds = array<i64: 1, 128>}, {transform_indices = @transform_3, window_bounds = array<i64: 8, 128>}]} {
    %c0_i32 = arith.constant 0 : i32
    %0 = arith.cmpi eq, %arg1, %c0_i32 : i32
    %1 = arith.extui %0 : i1 to i32
    %c0_i32_0 = arith.constant 0 : i32
    %2 = arith.cmpi ne, %1, %c0_i32_0 : i32
    scf.if %2 {
      %cst_10 = arith.constant 0xFF800000 : f32
      %13 = vector.broadcast %cst_10 : f32 to vector<8x128xf32>
      %c0_11 = arith.constant 0 : index
      %c0_12 = arith.constant 0 : index
      %14 = vector.load %arg6[%c0_11, %c0_12] : memref<8x128xf32, #tpu.memory_space<vmem>>, vector<8x128xf32>
      tpu.vector_store %arg6[%c0_11, %c0_12], %13 {strides = array<i32>} : memref<8x128xf32, #tpu.memory_space<vmem>>, vector<8x128xf32>,
    } else {
    }
    %c0 = arith.constant 0 : index
    %c0_1 = arith.constant 0 : index
    %c0_2 = arith.constant 0 : index
    %3 = vector.load %arg2[%c0, %c0_1, %c0_2] : memref<1x8x128xbf16, #tpu.memory_space<vmem>>, vector<1x8x128xbf16>
    %4 = vector.shape_cast %3 : vector<1x8x128xbf16> to vector<8x128xbf16>
    %c0_3 = arith.constant 0 : index
    %c0_4 = arith.constant 0 : index
    %5 = vector.load %arg3[%c0_3, %c0_4] : memref<128x128xbf16, #tpu.memory_space<vmem>>, vector<128x128xbf16>
    %cst = arith.constant dense<0.000000e+00> : vector<8x128xf32>
    %6 = tpu.matmul %4, %5, %cst {dimension_numbers = #tpu.dot_dimension_numbers<[1], [0], [0], [1], [0, 0, 1, 1], [], []>} : vector<8x128xbf16>, vector<128x128xbf16>, vector<8x128xf32> -> vector<8x128xf32>
    %c0_5 = arith.constant 0 : index
    %c0_6 = arith.constant 0 : index
    %7 = vector.load %arg6[%c0_5, %c0_6] : memref<8x128xf32, #tpu.memory_space<vmem>>, vector<8x128xf32>
    %8 = arith.maximumf %7, %6 : vector<8x128xf32>
    %c0_7 = arith.constant 0 : index
    %c0_8 = arith.constant 0 : index
    %9 = vector.load %arg6[%c0_7, %c0_8] : memref<8x128xf32, #tpu.memory_space<vmem>>, vector<8x128xf32>
    tpu.vector_store %arg6[%c0_7, %c0_8], %8 {strides = array<i32>} : memref<8x128xf32, #tpu.memory_space<vmem>>, vector<8x128xf32>,
    %c11_i32 = arith.constant 11 : i32
    %10 = arith.cmpi eq, %arg1, %c11_i32 : i32
    %11 = arith.extui %10 : i1 to i32
    %c0_i32_9 = arith.constant 0 : i32
    %12 = arith.cmpi ne, %11, %c0_i32_9 : i32
    scf.if %12 {
      %c0_10 = arith.constant 0 : index
      %c0_11 = arith.constant 0 : index
      %13 = vector.load %arg6[%c0_10, %c0_11] : memref<8x128xf32, #tpu.memory_space<vmem>>, vector<8x128xf32>
      %c0_12 = arith.constant 0 : index
      %c0_13 = arith.constant 0 : index
      %14 = vector.load %arg4[%c0_12, %c0_13] : memref<1x128xf32, #tpu.memory_space<vmem>>, vector<1x128xf32>
      %15 = vector.broadcast %14 : vector<1x128xf32> to vector<8x128xf32>
      %16 = arith.addf %13, %15 : vector<8x128xf32>
      %cst_14 = arith.constant 0.000000e+00 : f32
      %17 = vector.broadcast %cst_14 : f32 to vector<8x128xf32>
      %18 = arith.maximumf %16, %17 : vector<8x128xf32>
      %19 = arith.truncf %18 : vector<8x128xf32> to vector<8x128xbf16>
      %c0_15 = arith.constant 0 : index
      %c0_16 = arith.constant 0 : index
      %20 = vector.load %arg5[%c0_15, %c0_16] : memref<8x128xbf16, #tpu.memory_space<vmem>>, vector<8x128xbf16>
      tpu.vector_store %arg5[%c0_15, %c0_16], %19 {strides = array<i32>} : memref<8x128xbf16, #tpu.memory_space<vmem>>, vector<8x128xbf16>,
    } else {
    }
    return
  }
  func.func @transform_0(%arg0: i32, %arg1: i32) -> (i32, i32, i32) {
    %c0_i32 = arith.constant 0 : i32
    %c0_i32_0 = arith.constant 0 : i32
    return %arg1, %arg0, %c0_i32 : i32, i32, i32
  }
  func.func @transform_1(%arg0: i32, %arg1: i32) -> (i32, i32) {
    %c0_i32 = arith.constant 0 : i32
    %c0_i32_0 = arith.constant 0 : i32
    %c0_i32_1 = arith.constant 0 : i32
    return %c0_i32, %c0_i32_0 : i32, i32
  }
  func.func @transform_2(%arg0: i32, %arg1: i32) -> (i32, i32) {
    %c0_i32 = arith.constant 0 : i32
    %c0_i32_0 = arith.constant 0 : i32
    %c0_i32_1 = arith.constant 0 : i32
    return %c0_i32, %c0_i32_0 : i32, i32
  }
  func.func @transform_3(%arg0: i32, %arg1: i32) -> (i32, i32) {
    %c0_i32 = arith.constant 0 : i32
    %c0_i32_0 = arith.constant 0 : i32
    return %arg0, %c0_i32 : i32, i32
  }
}

</mosaic_0001>

<bundles_post_ra>
// kernel: tpu_custom_call.1
= control target key start
LH: loop header
LB: loop body
LE: loop exit
PB: predicated region body
PF: predicated region fallthrough
CT: control target
= control target key end

     0   :  { %8 = vsyncpa [#allocation4], 0  ;;  %s921_s0 = inlined_call_operand.hbm [shape: bf16[12,8,128], index: 0, kind: input, shape index: {}]   ;;  %s922_s1 = inlined_call_operand.hbm [shape: bf16[128,128], index: 1, kind: input, shape index: {}]   ;;  %s923_s2 = inlined_call_operand.vmem [shape: f32[1,128], index: 2, kind: input, shape index: {}]   ;;  %s924_s3 = inlined_call_operand.hbm [shape: bf16[8,128], index: 3, kind: output, shape index: {}]  }
   0x1   :  { %10 = vsyncpa [#allocation4 + $0x1], 0 }
   0x2   :  { %11 = vsyncpa [#allocation7], 0 }
   0x3   :  { %12 = vsyncpa [#allocation5], 0  ;;  %s731_s12 = smov 0   ;;  %s733_s13 = smov 0  }
   0x4   :  { %s735_s14 = smov 0   ;;  %s737_s15 = smov 0  }
   0x5   :  { %s739_s16 = smov 0   ;;  %s741_s17 = smov 0  }
   0x6 LB: > { %s420_s18 = sadd.s32 4294967295, %s701_s17   ;;  %p52_p0 = scmp.ne.s32.totalorder %s685_s13, %s681_s12  ;;  %s701_s17 = sphi %s741_s17, %s18_s17   ;;  %s697_s16 = sphi %s739_s16, %s942_s16   ;;  %s693_s15 = sphi %s737_s15, %s941_s15   ;;  %s689_s14 = sphi %s735_s14, %s940_s14   ;;  %s685_s13 = sphi %s733_s13, %s939_s13   ;;  %s681_s12 = sphi %s731_s12, %s938_s12  }
   0x7   : > { %p763_p1 = scmp.eq.s32.totalorder %s420_s18, 0  ;;  %p421_p2 = scmp.ge.s32.totalorder %s701_s17, 1 }
   0x8   : > { %p131_p3 = scmp.lt.s32.totalorder %s701_s17, 13  ;;  %s703_s22 = smov [#allocation6]  }
   0x9   : > { %s929_s19 = scalar_select %p763_p1, 1, 0 }
   0xa   : > { %p771_p4 = por %p763_p1, %p52_p0  ;;  %p775_p5 = pnand %p421_p2, %p131_p3 }
   0xb   : > { %s143_s23 = sshll.u32 %s703_s22, 4  ;;  %s27_s25 = sadd.s32 1, %s697_s16  ;;  %s144_s23 = int_to_ptr.vmem [resolvable:$true] %s143_s23 }
   0xc   : > { %s930_s20 = scalar_select %p771_p4, 1, 0 }
   0xd   : > { %s931_s21 = scalar_select %p775_p5, 1, 0 }
   0xe   : > { %p483_p6 = pneg %p775_p5  ;;  %s559_s28 = scalar_lea.hbm %s922_s1, 1024 }
   0xf   : > { %p560_p8 = scmp.ne.s32.totalorder %s922_s1, %s559_s28  ;;  %p566_p12 = scmp.lt.u32.totalorder %s559_s28, %s922_s1 }
  0x10   : > { %p783_p7 = pnand %p483_p6, %p763_p1 }
  0x12   : > { %p561_p9 = pneg %p783_p7 }
  0x14   : > { %p562_p10 = pnand %p561_p9, %p560_p8 }
  0x16   : > { %p563_p11 = pneg %p562_p10 }
  0x18   : > { %p568_p13 = pnand %p566_p12, %p563_p11 }
  0x1a   : > { %571 = shalt.err (!%p568_p13)
}
  0x1b   : > { %s572_s6 = scalar_lea.vmem %s144_s23, 1024  ;;  %p580_p6 = scmp.lt.s32.totalorder %s144_s23, %s144_s23 }
  0x1c   : > { %p573_p0 = scmp.ne.s32.totalorder %s144_s23, %s572_s6  ;;  %p581_p1 = scmp.lt.s32.totalorder %s572_s6, %s572_s6 }
  0x1e   : > { %p575_p2 = pnand %p573_p0, %p561_p9  ;;  %p582_p4 = por %p581_p1, %p580_p6 }
  0x20   : > { %p576_p3 = pneg %p575_p2 }
  0x22   : > { %p583_p5 = pnand %p582_p4, %p576_p3 }
  0x24   : > { %586 = shalt.err (!%p583_p5)
}
  0x25   : > { %s704_s7 = smov 64   ;;  %s705_s8 = smov 4  }
  0x26   : > { %486 = dma.hbm_to_vmem [thread:$0]  (!%p783_p7), %s922_s1, 1024, %s144_s23, [#allocation7], %s704_s7, %s704_s7, %s705_s8  }
  0x27   : > { %p28_p1 = scmp.ge.s32.totalorder %s27_s25, 12  ;;  %s39_s11 = sadd.s32 1, %s689_s14 }
  0x28   : > { %p46_p4 = scmp.ne.s32.totalorder %s689_s14, %s685_s13  ;;  %p47_p5 = scmp.eq.s32.totalorder %s701_s17, 0 }
  0x29   : > { %s944_s25 = smov (%p28_p1, %s27_s25), 0  ;;  %p492_p9 = scmp.lt.s32.totalorder %s701_s17, 12 }
  0x2a   : > { %p48_p8 = por %p47_p5, %p46_p4  ;;  %s34_s12 = ssub.s32 %s697_s16, %s944_s25 }
  0x2b   : > { %s160_s22 = sand.u32 1, %s689_s14   ;;  %p37_p10 = scmp.eq.s32.totalorder %s34_s12, 0 }
  0x2c   : > { %s424_s26 = sshll.u32 %s160_s22, 2  ;;  %s425_s27 = sshll.u32 %s697_s16, 6 }
  0x2d   : > { %s816_s28 = scalar_select %p37_p10, %s689_s14, %s39_s11  }
  0x2e   : > { %s821_s23 = scalar_lea.hbm %s921_s0, %s425_s27  ;;  %s164_s30 = scalar_lea.vmem [#allocation3], %s424_s26 }
  0x2f   : > { %s172_s4 = sshll.u32 %s164_s30, 4  ;;  %p823_p7 = pnand %p492_p9, %p48_p8  ;;  %s827_s4 = int_to_ptr.vmem [resolvable:$true] %s172_s4 }
  0x30   : > { %s161_s6 = scalar_lea.sflag [#allocation4], %s160_s22  ;;  %s587_s7 = scalar_lea.hbm %s821_s23, 64 }
  0x31   : > { %p588_p11 = scmp.ne.s32.totalorder %s821_s23, %s587_s7  ;;  %p589_p12 = pneg %p823_p7 }
  0x32   : > { %s592_s10 = scalar_lea.hbm %s921_s0, 768  ;;  %p593_p2 = scmp.lt.u32.totalorder %s821_s23, %s921_s0 }
  0x33   : > { %p590_p13 = pnand %p589_p12, %p588_p11  ;;  %p594_p3 = scmp.lt.u32.totalorder %s592_s10, %s587_s7 }
  0x34   : > { %p596_p1 = scmp.lt.u32.totalorder %s587_s7, %s821_s23 }
  0x35   : > { %p591_p0 = pneg %p590_p13  ;;  %p595_p6 = por %p594_p3, %p593_p2 }
  0x37   : > { %p597_p4 = por %p596_p1, %p595_p6 }
  0x39   : > { %p598_p5 = pnand %p597_p4, %p591_p0 }
  0x3b   : > { %601 = shalt.err (!%p598_p5)
}
  0x3c   : > { %s602_s22 = scalar_lea.vmem %s827_s4, 64  ;;  %s706_s26 = smov [#allocation3]  }
  0x3d   : > { %p603_p8 = scmp.ne.s32.totalorder %s827_s4, %s602_s22  ;;  %s607_s27 = sshll.u32 %s706_s26, 4  ;;  %s608_s27 = int_to_ptr.vmem [resolvable:$false] %s607_s27 }
  0x3e   : > { %s609_s24 = scalar_lea.vmem %s608_s27, 128  ;;  %p610_p11 = scmp.lt.s32.totalorder %s827_s4, %s608_s27 }
  0x3f   : > { %p605_p9 = pnand %p603_p8, %p589_p12  ;;  %p611_p13 = scmp.lt.s32.totalorder %s609_s24, %s602_s22 }
  0x41   : > { %p606_p10 = pneg %p605_p9  ;;  %p612_p2 = por %p611_p13, %p610_p11 }
  0x43   : > { %p613_p3 = pnand %p612_p2, %p606_p10 }
  0x45   : > { %616 = shalt.err (!%p613_p3)
}
  0x46   : > { %490 = dma.hbm_to_vmem [thread:$0]  (!%p823_p7), %s821_s23, 64, %s827_s4, %s161_s6  }
  0x47   : > { %p934_p0 = scmp.ne.s32.totalorder %s931_s21, 0 }
  0x48   : > { %s183_s29 = sand.u32 (!%p934_p0), 1, %s685_s13   ;;  %p935_p12 = scmp.ne.s32.totalorder (!%p934_p0), %s930_s20, 0 }
  0x49   : > { %181 = sbr.rel (%p934_p0) target bundleno = 380 (0x17c), region = 32  ;;  %s857_s30 = sshll.u32 (!%p934_p0), %s183_s29, 2 }
  0x4a   : > { %s184_s7 = scalar_lea.sflag (!%p934_p0), [#allocation4], %s183_s29  ;;  %s187_s8 = scalar_lea.vmem (!%p934_p0), [#allocation3], %s857_s30 }
  0x50   : > { %668 = dma.done.wait (%p935_p12), %s184_s7, 64  }
  0x51   : > { %670 = vsyncadd (%p935_p12), %s184_s7, 4294967232  ;;  %p936_p6 = scmp.ne.s32.totalorder %s929_s19, 0 }
  0x53   : > { %672 = dma.done.wait (%p936_p6), [#allocation7], 1024  }
  0x54   : > { %674 = vsyncadd (%p936_p6), [#allocation7], 4294966272  ;;  %p429_p7 = scmp.ne.s32.totalorder %s693_s15, 0 }
  0x55   : > { %v707_v0 = vmov (!%p429_p7), -inf  }
  0x56   : > { %213 = sbr.rel (%p429_p7) target bundleno = 93 (0x5d), region = 44  ;;  %214 = vst [vmem:[#allocation2] sm:$0xff] (!%p429_p7), %v707_v0 }
  0x5d PF: > { %v551_v1 = vld [vmem:[#allocation6] sm:$0xff]   ;;  %v708_v2 = vmov 0.0   ;;  %v552_v3 = vld [vmem:[#allocation6 + $0x8] sm:$0xff]   ;;  %vm709_vm0 = vmmov 0   ;;  %v553_v4 = vld [vmem:[#allocation6 + $0x10] sm:$0xff]   ;;  %p438_p1 = scmp.ne.s32.totalorder %s693_s15, 11 }
  0x5e   : > { %453 = vmatprep.subr.bf16.mxu0 %v708_v2  ;;  %469 = vmatprep.mubr.msk.bf16.mxu0 %vm709_vm0, %v708_v2  ;;  %v554_v5 = vld [vmem:[#allocation6 + $0x18] sm:$0xff]   ;;  %v555_v6 = vld [vmem:[#allocation6 + $0x20] sm:$0xff]   ;;  %v556_v7 = vld [vmem:[#allocation6 + $0x28] sm:$0xff]  }
  0x5f   : > { %454 = vmatpush3.bf16.msra.mxu0 %v551_v1  ;;  %v557_v8 = vld [vmem:[#allocation6 + $0x30] sm:$0xff]   ;;  %v558_v9 = vld [vmem:[#allocation6 + $0x38] sm:$0xff]  }
  0x60   : > { %455 = vmatprep.subr.bf16.mxu0 %v708_v2  ;;  %v215_v10 = vld [vmem:[%s187_s8] sm:$0xf]  ;;  %v320_v11 = vld [vmem:[#allocation2] sm:$0xff] }
  0x61   : > { %v439_v18 = vld [vmem:[%s923_s2] ss:$0 sm:$0xff] (!%p438_p1) }
  0x63   : > { %456 = vmatpush3.bf16.msra.mxu0 %v552_v3 }
  0x64   : > { %457 = vmatprep.subr.bf16.mxu0 %v708_v2 }
  0x67   : > { %458 = vmatpush3.bf16.msra.mxu0 %v553_v4 }
  0x68   : > { %459 = vmatprep.subr.bf16.mxu0 %v708_v2 }
  0x6b   : > { %460 = vmatpush3.bf16.msra.mxu0 %v554_v5 }
  0x6c   : > { %461 = vmatprep.subr.bf16.mxu0 %v708_v2 }
  0x6f   : > { %462 = vmatpush3.bf16.msra.mxu0 %v555_v6 }
  0x70   : > { %463 = vmatprep.subr.bf16.mxu0 %v708_v2 }
  0x73   : > { %464 = vmatpush3.bf16.msra.mxu0 %v556_v7 }
  0x74   : > { %465 = vmatprep.subr.bf16.mxu0 %v708_v2 }
  0x77   : > { %466 = vmatpush3.bf16.msra.mxu0 %v557_v8 }
  0x78   : > { %467 = vmatprep.subr.bf16.mxu0 %v708_v2 }
  0x7b   : > { %468 = vmatpush3.bf16.msra.mxu0 %v558_v9 }
  0x7e   : > { %470 = vmatmul.mubr.bf16.vlgmr.msra.gmra.mrb[0].mxu0 %v215_v10 }
 0x14e   : > { %326 = sbr.rel (%p438_p1) target bundleno = 355 (0x163), region = 48 }
 0x151   : > { %v314_v12 = vpop.f32.mrb[0].mxu0 }
 0x152   : > { %v321_v13 = vmax.f32 %v320_v11, %v314_v12  ;;  %v471_v14 = vpop.f32.mrb[1].mxu0 }
 0x153   : > { %v317_v15 = vpop.f32.mrb[2].mxu0 }
 0x154   : > { %322 = vst [vmem:[#allocation2] sm:$0xff] %v321_v13  ;;  %v472_v16 = vpop.f32.mrb[3].mxu0 }
 0x15b   : > { %v327_v17 = vld [vmem:[#allocation2] sm:$0xff] }
 0x15c   : > { %v335_v19 = vadd.f32 %v439_v18, %v327_v17 }
 0x15e   : > { %v336_v20 = vmax.f32 %v335_v19, 0.0 }
 0x160   : > { %v337_v21 = vpack.c.bf16 %v336_v20, %v336_v20 }
 0x162   : > { %338 = vst [vmem:[#allocation8] sm:$0xf] %v337_v21 }
 0x163 PF: > { %p877_p4 = scmp.eq.s32.totalorder %s420_s18, 11  ;;  %s710_s23 = smov [#allocation8]  }
 0x164   : > { %s348_s15 = sshll.u32 %s710_s23, 4  ;;  %s349_s15 = int_to_ptr.vmem [resolvable:$true] %s348_s15 }
 0x165   : > { %s617_s4 = scalar_lea.vmem %s349_s15, 64  ;;  %p624_p10 = scmp.lt.s32.totalorder %s349_s15, %s349_s15 }
 0x166   : > { %p618_p5 = scmp.ne.s32.totalorder %s349_s15, %s617_s4  ;;  %p625_p11 = scmp.lt.s32.totalorder %s617_s4, %s617_s4 }
 0x168   : > { %p619_p8 = pnand %p618_p5, %p877_p4  ;;  %p626_p13 = por %p625_p11, %p624_p10 }
 0x16a   : > { %p620_p9 = pneg %p619_p8 }
 0x16c   : > { %p627_p2 = pnand %p626_p13, %p620_p9 }
 0x16e   : > { %630 = shalt.err (!%p627_p2)
}
 0x16f   : > { %s631_s18 = scalar_lea.hbm %s924_s3, 64 }
 0x170   : > { %p632_p3 = scmp.ne.s32.totalorder %s924_s3, %s631_s18  ;;  %p637_p6 = scmp.lt.u32.totalorder %s631_s18, %s924_s3 }
 0x172   : > { %p633_p0 = pnand %p632_p3, %p877_p4 }
 0x174   : > { %p634_p12 = pneg %p633_p0 }
 0x176   : > { %p639_p7 = pnand %p637_p6, %p634_p12 }
 0x178   : > { %642 = shalt.err (!%p639_p7)
}
 0x179   : > { %480 = dma.vmem_to_hbm [thread:$0]  (%p877_p4), %s349_s15, 64, %s924_s3, [#allocation5]  }
 0x17a   : > { %676 = dma.done.wait (%p877_p4), [#allocation5], 64  }
 0x17b   : > { %678 = vsyncadd (%p877_p4), [#allocation5], 4294967232 }
 0x17c PF: > { %s18_s17 = sadd.s32 1, %s701_s17   ;;  %s938_s12 = smov %s685_s13 }
 0x17d   : > { %p15_p1 = scmp.ge.s32.totalorder %s18_s17, 14   ;;  %s939_s13 = smov %s689_s14 }
 0x17e   : > { %s940_s14 = smov %s816_s28  ;;  %s941_s15 = smov %s697_s16 }
 0x17f   : > { %s942_s16 = smov %s944_s25  ;;  %17 = sbr.rel (!%p15_p1) target bundleno = 6 (0x6), region = 82 }
 0x186   :  { %361 = vsyncpa [#allocation4], 1 }
 0x187   :  { %363 = vsyncpa [#allocation4 + $0x1], 1 }
 0x188   :  { %364 = vsyncpa [#allocation7], 1 }
 0x189   :  { %365 = vsyncpa [#allocation5], 1 }
 0x18a   :  { %367 = vsyncpa [#allocation5 + $0x1], 1 }

</bundles_post_ra>
